<compile_context>
chip_gen: v7x
topology: tpu7x:2x2x1
jax: 0.10.0
libtpu: 0.0.40
codegen_flags: <defaults>
</compile_context>

<pallas_src>
import functools

import jax
import jax.numpy as jnp
from jax.experimental import pallas as pl
from jax.experimental.pallas import tpu as pltpu

LANE = 128


def _round_up(v, m):
    return -(-v // m) * m


def prenorm_kernel(x_ref, w_ref, b_ref, o_ref, *, eps, nb, needs_cast):
    # x_ref: (nb, C, T)   w_ref: (C, C) bf16 (LN gain folded)   b_ref: (C, 1) f32
    C, T = o_ref.shape[1], o_ref.shape[2]
    w = w_ref[...]                                        # resident bf16 weight
    b_b = jnp.broadcast_to(b_ref[...], (C, T))            # hoisted once per step
    inv_c = jnp.float32(1.0 / C)

    for i in range(nb):                                   # nb is small & static
        x = x_ref[i]                                      # (C, T)
        if needs_cast:
            x = x.astype(jnp.float32)

        # Single-pass LayerNorm statistics over channels (torch dim=1,
        # unbiased=False): var = E[x^2] - mean^2.  All stats in f32.
        mean = jnp.sum(x, axis=0, keepdims=True) * inv_c          # (1, T)
        ex2 = jnp.sum(x * x, axis=0, keepdims=True) * inv_c       # (1, T)
        var = ex2 - mean * mean
        xn = (x - mean) * jax.lax.rsqrt(var + jnp.float32(eps))   # (C, T) VPU/EUP

        # fn: pointwise 1x1 conv; bf16 operands, f32 accumulation on the MXU.
        y = jnp.dot(w, xn.astype(jnp.bfloat16),
                    preferred_element_type=jnp.float32)           # (C, T)
        o_ref[i] = (y + b_b).astype(o_ref.dtype)


def _vmem_capacity_bytes():
    try:
        return int(pltpu.get_tpu_info().vmem_capacity_bytes)
    except Exception:
        return 64 << 20          # conservative fallback: v7x per-TC physical VMEM


def _choose_tiles(N, C, HW, dtype):
    """Pick (nb, t_hw, HW_pad, vmem_limit) for the pipelined grid."""
    itemsize = jnp.dtype(dtype).itemsize
    c_pad = max(8, _round_up(C, 8))                 # sublane padding of the C axis
    vmem_phys = _vmem_capacity_bytes()

    # Generation-aware budget for the pipelined working set: 128-MiB chips
    # (v5e/v6e) can take much larger blocks than 64-MiB v7x.
    if vmem_phys >= (96 << 20):
        budget, t_cap = 40 << 20, 8192
    else:
        budget, t_cap = 16 << 20, 2048

    # Per lane: double-buffered in (f32) + out (dtype) block columns for one
    # image, plus ~4 block-sized f32 temporaries (x, x*x, xn, acc) that the
    # per-image loop keeps live regardless of nb.
    io_per_lane = c_pad * (2 * 4 + 2 * itemsize)
    tmp_per_lane = 4 * c_pad * 4

    def ws_bytes(nb_, t_):
        return (nb_ * io_per_lane + tmp_per_lane) * t_

    hw128 = _round_up(HW, LANE)

    # 1) Lane tile: biggest multiple of 128 within the cap and budget (nb=1).
    #    HW is padded up to a multiple of t in the wrapper, so there is no
    #    divisibility fallback that could collapse t to 128 lanes.
    t = min(t_cap, hw128,
            ((budget // (io_per_lane + tmp_per_lane)) // LANE) * LANE)
    t = max(LANE, t)

    # 2) Batch packing: any divisor of N, used when the HW grid is short or C
    #    is small (kernel is HBM-bound), to amortize ~0.35 us/step overhead
    #    and keep DMAs large and lane-dense.
    def pick_nb(t_):
        n_hw = _round_up(HW, t_) // t_
        if C <= 128 or n_hw <= 4:
            for d in range(min(N, 8), 1, -1):
                if N % d == 0 and ws_bytes(d, t_) <= budget:
                    return d
        return 1

    nb = pick_nb(t)

    # 3) Guarantee >= 2 grid steps so both v7x TensorCores get work
    #    (negligible cost on single-TC v5e/v6e).
    def grid_steps(nb_, t_):
        return (N // nb_) * (_round_up(HW, t_) // t_)

    while grid_steps(nb, t) < 2:
        if nb > 1:
            nb = 1
        elif t > LANE:
            t = max(LANE, ((t // 2) // LANE) * LANE)
        else:
            break

    HW_pad = _round_up(HW, t)

    # VMEM limit from the buffers actually used (pipelined blocks, resident
    # params, temp headroom) -- safe on v7x's 64 MiB physical VMEM.
    w_bytes = 2 * _round_up(C, 16) * _round_up(C, LANE) * 2      # bf16, 2 bufs
    b_bytes = 2 * c_pad * LANE * 4
    need = ws_bytes(nb, t) + w_bytes + b_bytes
    vmem_limit = int(min(max(int(need * 1.3) + (2 << 20), 8 << 20),
                         (vmem_phys * 3) // 4))
    return nb, t, HW_pad, vmem_limit


def prenorm(x_nchw, g, w, b, out_dtype=None):
    """PreNorm forward.  x_nchw: (N, C, H, W); g: (C,); w: (C, C); b: (C,).

    out_dtype defaults to x's dtype; on purely HBM-bound chips (v5e) a bf16
    output halves the write stream if the downstream consumer tolerates it.
    """
    N, C, H, W = x_nchw.shape
    HW = H * W
    out_dtype = x_nchw.dtype if out_dtype is None else out_dtype
    # Matches the PyTorch module: eps = 1e-5 for f32, 1e-3 otherwise.
    eps = 1e-5 if x_nchw.dtype == jnp.float32 else 1e-3

    nb, t_hw, HW_pad, vmem_limit = _choose_tiles(N, C, HW, x_nchw.dtype)

    x = x_nchw.reshape(N, C, HW)
    if HW_pad != HW:
        # Keep stores lane-dense (unmasked vst); padded columns sliced off below.
        x = jnp.pad(x, ((0, 0), (0, 0), (0, HW_pad - HW)))

    # Fold LN gain into the (linear) 1x1-conv weight: W @ (g * xn) == (W * g) @ xn.
    # Exact only because fn is linear; a nonlinear fn needs the explicit multiply.
    w2 = (w.astype(jnp.float32) * g.astype(jnp.float32)[None, :]).astype(jnp.bfloat16)
    b2 = b.reshape(C, 1).astype(jnp.float32)

    kernel = functools.partial(prenorm_kernel, eps=float(eps), nb=nb,
                               needs_cast=(x_nchw.dtype != jnp.float32))

    out = pl.pallas_call(
        kernel,
        out_shape=jax.ShapeDtypeStruct((N, C, HW_pad), out_dtype),
        grid_spec=pltpu.PrefetchScalarGridSpec(
            num_scalar_prefetch=0,
            grid=(N // nb, HW_pad // t_hw),
            in_specs=[
                pl.BlockSpec((nb, C, t_hw), lambda n, h: (n, 0, h)),
                pl.BlockSpec((C, C), lambda n, h: (0, 0)),   # stays VMEM-resident
                pl.BlockSpec((C, 1), lambda n, h: (0, 0)),   # stays VMEM-resident
            ],
            out_specs=pl.BlockSpec((nb, C, t_hw), lambda n, h: (n, 0, h)),
        ),
        compiler_params=pltpu.CompilerParams(
            dimension_semantics=("parallel", "parallel"),
            vmem_limit_bytes=vmem_limit,
        ),
    )(x, w2, b2)

    return out[:, :, :HW].reshape(N, C, H, W)


def prenorm_ref(x_nchw, g, w, b):
    eps = 1e-5
    mean = jnp.mean(x_nchw, axis=1, keepdims=True)
    var = jnp.mean((x_nchw - mean) ** 2, axis=1, keepdims=True)
    xn = (x_nchw - mean) * jax.lax.rsqrt(var + eps) * g.reshape(1, -1, 1, 1)
    y = jnp.einsum("oc,nchw->nohw", w, xn) + b.reshape(1, -1, 1, 1)
    return y


if __name__ == "__main__":
    key = jax.random.PRNGKey(0)
    kx, kw, kb = jax.random.split(key, 3)

    N, C, H, W = 2, 4, 16, 16
    x = jax.random.normal(kx, (N, C, H, W), dtype=jnp.float32)

    # Deterministic parameters:
    # LayerNorm gain g initialized to ones (as in nn.Parameter(torch.ones(...)));
    # fn = pointwise 1x1 conv with deterministic random weights/bias.
    g = jnp.ones((C,), dtype=jnp.float32)
    w_fn = jax.random.normal(kw, (C, C), dtype=jnp.float32) * 0.1
    b_fn = jax.random.normal(kb, (C,), dtype=jnp.float32) * 0.1
    # TODO(synk): `fn` is a user-supplied module in PreNorm; instantiated here
    # as a 1x1 conv so the wrapped compute also runs inside the Pallas kernel.

    out = prenorm(x, g, w_fn, b_fn)
    jax.block_until_ready(out)

    ref = prenorm_ref(x, g, w_fn, b_fn)
    # Tolerance covers bf16 rounding at the MXU boundary (f32 accumulation).
    assert jnp.allclose(out, ref, atol=2e-2, rtol=2e-2), (
        float(jnp.max(jnp.abs(out - ref))))
    print("KERNEL_OK")
</pallas_src>

<mosaic_0001>
module attributes {stable_mosaic.version = 11 : i64} {
  func.func @prenorm_kernel(%arg0: i32, %arg1: i32, %arg2: memref<1x4x256xf32, #tpu.memory_space<vmem>>, %arg3: memref<4x4xbf16, #tpu.memory_space<vmem>>, %arg4: memref<4x1xf32, #tpu.memory_space<vmem>>, %arg5: memref<1x4x256xf32, #tpu.memory_space<vmem>>) attributes {dimension_semantics = [#tpu.dimension_semantics<parallel>, #tpu.dimension_semantics<parallel>], iteration_bounds = array<i64: 2, 1>, scalar_prefetch = 0 : i64, scratch_operands = 0 : i64, tpu.core_type = #tpu.core_type<tc>, window_params = [{transform_indices = @transform_0, window_bounds = array<i64: 1, 4, 256>}, {pipeline_mode = #tpu.pipeline_mode<synchronous>, transform_indices = @transform_1, window_bounds = array<i64: 4, 4>}, {pipeline_mode = #tpu.pipeline_mode<synchronous>, transform_indices = @transform_2, window_bounds = array<i64: 4, 1>}, {transform_indices = @transform_3, window_bounds = array<i64: 1, 4, 256>}]} {
    %c0 = arith.constant 0 : index
    %c0_0 = arith.constant 0 : index
    %0 = vector.load %arg3[%c0, %c0_0] : memref<4x4xbf16, #tpu.memory_space<vmem>>, vector<4x4xbf16>
    %c0_1 = arith.constant 0 : index
    %c0_2 = arith.constant 0 : index
    %1 = vector.load %arg4[%c0_1, %c0_2] : memref<4x1xf32, #tpu.memory_space<vmem>>, vector<4x1xf32>
    %2 = vector.shape_cast %1 : vector<4x1xf32> to vector<4x1xf32>
    %3 = vector.broadcast %2 : vector<4x1xf32> to vector<4x256xf32>
    %c0_3 = arith.constant 0 : index
    %c0_4 = arith.constant 0 : index
    %c0_5 = arith.constant 0 : index
    %4 = vector.load %arg2[%c0_3, %c0_4, %c0_5] : memref<1x4x256xf32, #tpu.memory_space<vmem>>, vector<1x4x256xf32>
    %5 = vector.shape_cast %4 : vector<1x4x256xf32> to vector<4x256xf32>
    %cst = arith.constant dense<0.000000e+00> : vector<256xf32>
    %6 = vector.multi_reduction <add>, %5, %cst [0] : vector<4x256xf32> to vector<256xf32>
    %7 = vector.shape_cast %6 : vector<256xf32> to vector<1x256xf32>
    %cst_6 = arith.constant 2.500000e-01 : f32
    %8 = vector.broadcast %cst_6 : f32 to vector<1x256xf32>
    %9 = arith.mulf %7, %8 : vector<1x256xf32>
    %10 = arith.mulf %5, %5 : vector<4x256xf32>
    %cst_7 = arith.constant dense<0.000000e+00> : vector<256xf32>
    %11 = vector.multi_reduction <add>, %10, %cst_7 [0] : vector<4x256xf32> to vector<256xf32>
    %12 = vector.shape_cast %11 : vector<256xf32> to vector<1x256xf32>
    %cst_8 = arith.constant 2.500000e-01 : f32
    %13 = vector.broadcast %cst_8 : f32 to vector<1x256xf32>
    %14 = arith.mulf %12, %13 : vector<1x256xf32>
    %15 = arith.mulf %9, %9 : vector<1x256xf32>
    %16 = arith.subf %14, %15 : vector<1x256xf32>
    %17 = vector.broadcast %9 : vector<1x256xf32> to vector<4x256xf32>
    %18 = arith.subf %5, %17 : vector<4x256xf32>
    %cst_9 = arith.constant 9.99999974E-6 : f32
    %19 = vector.broadcast %cst_9 : f32 to vector<1x256xf32>
    %20 = arith.addf %16, %19 : vector<1x256xf32>
    %21 = math.rsqrt %20 : vector<1x256xf32>
    %22 = vector.broadcast %21 : vector<1x256xf32> to vector<4x256xf32>
    %23 = arith.mulf %18, %22 : vector<4x256xf32>
    %24 = arith.truncf %23 : vector<4x256xf32> to vector<4x256xbf16>
    %cst_10 = arith.constant dense<0.000000e+00> : vector<4x256xf32>
    %25 = tpu.matmul %0, %24, %cst_10 {dimension_numbers = #tpu.dot_dimension_numbers<[1], [0], [0], [1], [0, 0, 1, 1], [], []>} : vector<4x4xbf16>, vector<4x256xbf16>, vector<4x256xf32> -> vector<4x256xf32>
    %26 = arith.addf %25, %3 : vector<4x256xf32>
    %c0_11 = arith.constant 0 : index
    %c0_12 = arith.constant 0 : index
    %c0_13 = arith.constant 0 : index
    %27 = vector.load %arg5[%c0_11, %c0_12, %c0_13] : memref<1x4x256xf32, #tpu.memory_space<vmem>>, vector<1x4x256xf32>
    %28 = vector.shape_cast %27 : vector<1x4x256xf32> to vector<4x256xf32>
    %29 = vector.shape_cast %26 : vector<4x256xf32> to vector<1x4x256xf32>
    tpu.vector_store %arg5[%c0_11, %c0_12, %c0_13], %29 {strides = array<i32>} : memref<1x4x256xf32, #tpu.memory_space<vmem>>, vector<1x4x256xf32>,
    return
  }
  func.func @transform_0(%arg0: i32, %arg1: i32) -> (i32, i32, i32) {
    %c0_i32 = arith.constant 0 : i32
    %c0_i32_0 = arith.constant 0 : i32
    return %arg0, %c0_i32, %arg1 : i32, i32, i32
  }
  func.func @transform_1(%arg0: i32, %arg1: i32) -> (i32, i32) {
    %c0_i32 = arith.constant 0 : i32
    %c0_i32_0 = arith.constant 0 : i32
    %c0_i32_1 = arith.constant 0 : i32
    return %c0_i32, %c0_i32_0 : i32, i32
  }
  func.func @transform_2(%arg0: i32, %arg1: i32) -> (i32, i32) {
    %c0_i32 = arith.constant 0 : i32
    %c0_i32_0 = arith.constant 0 : i32
    %c0_i32_1 = arith.constant 0 : i32
    return %c0_i32, %c0_i32_0 : i32, i32
  }
  func.func @transform_3(%arg0: i32, %arg1: i32) -> (i32, i32, i32) {
    %c0_i32 = arith.constant 0 : i32
    %c0_i32_0 = arith.constant 0 : i32
    return %arg0, %c0_i32, %arg1 : i32, i32, i32
  }
}

</mosaic_0001>

<bundles_post_ra>
// kernel: tpu_custom_call.1
= control target key start
LH: loop header
LB: loop body
LE: loop exit
PB: predicated region body
PF: predicated region fallthrough
CT: control target
= control target key end

     0   :  { %8 = vsyncpa [#allocation3], 0  ;;  %s844_s0 = inlined_call_operand.hbm [shape: f32[2,4,256], index: 0, kind: input, shape index: {}]   ;;  %s845_s1 = inlined_call_operand.vmem [shape: bf16[4,4], index: 1, kind: input, shape index: {}]   ;;  %s846_s2 = inlined_call_operand.vmem [shape: f32[4,1], index: 2, kind: input, shape index: {}]   ;;  %s847_s3 = inlined_call_operand.hbm [shape: f32[2,4,256], index: 3, kind: output, shape index: {}]  }
   0x1   :  { %10 = vsyncpa [#allocation3 + $0x1], 0 }
   0x2   :  { %11 = vsyncpa [#allocation4], 0 }
   0x3   :  { %13 = vsyncpa [#allocation4 + $0x1], 0  ;;  %s662_s12 = smov 0   ;;  %s664_s13 = smov 0  }
   0x4   :  { %s666_s14 = smov 0   ;;  %s668_s15 = smov 0  }
   0x5   :  { %s670_s16 = smov 0   ;;  %s672_s17 = smov 0  }
   0x6 LB: > { %s437_s18 = sadd.s32 4294967295, %s637_s17   ;;  %s438_s19 = sadd.s32 4294967294, %s637_s17   ;;  %s637_s17 = sphi %s672_s17, %s19_s17   ;;  %s633_s16 = sphi %s670_s16, %s863_s16   ;;  %s629_s15 = sphi %s668_s15, %s862_s15   ;;  %s625_s14 = sphi %s666_s14, %s861_s14   ;;  %s621_s13 = sphi %s664_s13, %s860_s13   ;;  %s617_s12 = sphi %s662_s12, %s859_s12  }
   0x7   : > { %s31_s20 = sadd.s32 1, %s633_s16  ;;  %s40_s21 = sadd.s32 1, %s625_s14 }
   0x8   : > { %p33_p0 = scmp.ge.s32.totalorder %s31_s20, 2  ;;  %p47_p1 = scmp.ne.s32.totalorder %s625_s14, %s621_s13 }
   0x9   : > { %p48_p2 = scmp.eq.s32.totalorder %s637_s17, 0  ;;  %p53_p3 = scmp.ne.s32.totalorder %s621_s13, %s617_s12 }
   0xa   : > { %s865_s20 = smov (%p33_p0, %s31_s20), 0  ;;  %p54_p5 = scmp.eq.s32.totalorder %s437_s18, 0 }
   0xb   : > { %p703_p4 = por %p48_p2, %p47_p1  ;;  %s35_s23 = ssub.s32 %s633_s16, %s865_s20 }
   0xc   : > { %p121_p6 = scmp.eq.s32.totalorder %s437_s18, 1  ;;  %p38_p7 = scmp.eq.s32.totalorder %s35_s23, 0 }
   0xd   : > { %p709_p8 = por %p54_p5, %p53_p3  ;;  %p127_p10 = scmp.eq.s32.totalorder %s438_s19, 1 }
   0xe   : > { %p713_p9 = por %p121_p6, %p47_p1  ;;  %p468_p13 = scmp.lt.s32.totalorder %s637_s17, 2 }
   0xf   : > { %s718_s26 = scalar_select %p38_p7, %s625_s14, %s40_s21  }
  0x10   : > { %s851_s25 = scalar_select %p713_p9, 1, 0 }
  0x11   : > { %p720_p11 = por %p127_p10, %p53_p3  ;;  %s153_s28 = sand.u32 1, %s625_s14  }
  0x12   : > { %s441_s29 = sshll.u32 %s153_s28, 3  ;;  %s454_s30 = sshll.u32 %s633_s16, 7 }
  0x13   : > { %s852_s27 = scalar_select %p720_p11, 1, 0 }
  0x14   : > { %s731_s6 = scalar_lea.hbm %s844_s0, %s454_s30  ;;  %s157_s7 = scalar_lea.vmem [#allocation2], %s441_s29 }
  0x15   : > { %s167_s8 = sshll.u32 %s157_s7, 4  ;;  %p737_p0 = pnand %p468_p13, %p703_p4  ;;  %s733_s8 = int_to_ptr.vmem [resolvable:$true] %s167_s8 }
  0x16   : > { %s154_s10 = scalar_lea.sflag [#allocation3], %s153_s28  ;;  %s525_s11 = scalar_lea.hbm %s731_s6, 128 }
  0x17   : > { %p526_p3 = scmp.ne.s32.totalorder %s731_s6, %s525_s11  ;;  %p527_p5 = pneg %p737_p0 }
  0x18   : > { %s530_s21 = scalar_lea.hbm %s844_s0, 256  ;;  %p531_p4 = scmp.lt.u32.totalorder %s731_s6, %s844_s0 }
  0x19   : > { %p528_p6 = pnand %p527_p5, %p526_p3  ;;  %p532_p10 = scmp.lt.u32.totalorder %s530_s21, %s525_s11 }
  0x1a   : > { %p534_p12 = scmp.lt.u32.totalorder %s525_s11, %s731_s6 }
  0x1b   : > { %p529_p7 = pneg %p528_p6  ;;  %p533_p13 = por %p532_p10, %p531_p4 }
  0x1d   : > { %p535_p1 = por %p534_p12, %p533_p13 }
  0x1f   : > { %p536_p2 = pnand %p535_p1, %p529_p7 }
  0x21   : > { %539 = shalt.err (!%p536_p2)
}
  0x22   : > { %s540_s28 = scalar_lea.vmem %s733_s8, 128  ;;  %s639_s29 = smov [#allocation2]  }
  0x23   : > { %p541_p3 = scmp.ne.s32.totalorder %s733_s8, %s540_s28  ;;  %s545_s30 = sshll.u32 %s639_s29, 4  ;;  %s546_s30 = int_to_ptr.vmem [resolvable:$false] %s545_s30 }
  0x24   : > { %s547_s4 = scalar_lea.vmem %s546_s30, 256  ;;  %p548_p9 = scmp.lt.s32.totalorder %s733_s8, %s546_s30 }
  0x25   : > { %p543_p6 = pnand %p541_p3, %p527_p5  ;;  %p549_p4 = scmp.lt.s32.totalorder %s547_s4, %s540_s28 }
  0x27   : > { %p544_p11 = pneg %p543_p6  ;;  %p550_p10 = por %p549_p4, %p548_p9 }
  0x29   : > { %p551_p12 = pnand %p550_p10, %p544_p11 }
  0x2b   : > { %554 = shalt.err (!%p551_p12)
}
  0x2c   : > { %463 = dma.hbm_to_vmem [thread:$0]  (!%p737_p0), %s731_s6, 128, %s733_s8, %s154_s10  }
  0x2d   : > { %p854_p1 = scmp.lt.s32.totalorder %s637_s17, 3  ;;  %p855_p2 = scmp.ge.s32.totalorder %s637_s17, 1 }
  0x2f   : > { %p173_p5 = pnand %p855_p2, %p854_p1 }
  0x30   : > { %s773_s5 = sand.u32 (!%p173_p5), 1, %s621_s13  }
  0x31   : > { %176 = sbr.rel (%p173_p5) target bundleno = 335 (0x14f), region = 32  ;;  %s445_s7 = sshll.u32 (!%p173_p5), %s773_s5, 3 }
  0x32   : > { %s179_s11 = scalar_lea.sflag (!%p173_p5), [#allocation3], %s773_s5  ;;  %s182_s9 = scalar_lea.vmem (!%p173_p5), [#allocation2], %s445_s7 }
  0x38   : > { %608 = dma.done.wait (%p709_p8), %s179_s11, 128  }
  0x39   : > { %610 = vsyncadd (%p709_p8), %s179_s11, 4294967168  ;;  %v640_v0 = vmov 0   ;;  %vm219_vm0 = vcmask 1043456   ;;  %v215_v1 = vld [vmem:[%s182_s9] sm:$0xff]  ;;  %vm283_vm1 = vcmask 1041408   ;;  %vm279_vm2 = vcmask 31744  }
  0x3a   : > { %322 = vmatprep.mubr.bf16.mxu0 %v640_v0  ;;  %519 = vset.pattern.permute.xlu0 %v640_v0  ;;  %v209_v2 = vld [vmem:[%s846_s2] sm:$0xf]  ;;  %v217_v3 = vcombine.high %v215_v1, %v215_v1  ;;  %v220_v4 = vsel %vm219_vm0, %v215_v1, 0.0  ;;  %v236_v5 = vmul.f32 %v215_v1, %v215_v1  ;;  %s455_s18 = sshll.u32 %s629_s15, 7  ;;  %s204_s19 = scalar_lea.vmem [#allocation5], %s445_s7 }
  0x3b   : > { %212 = vperm.xlu0 %519, %v209_v2   ;;  %v221_v6 = vrot.slane %v220_v4, 4  ;;  %v208_v54 = vld [vmem:[%s845_s1] sm:$0x3]  ;;  %s353_s21 = sshll.u32 %s204_s19, 4  ;;  %s795_s28 = scalar_lea.hbm %s847_s3, %s455_s18  ;;  %s797_s21 = int_to_ptr.vmem [resolvable:$true] %s353_s21 }
  0x3c   : > { %v227_v7 = vsel %vm219_vm0, %v217_v3, 0.0  ;;  %v238_v8 = vcombine.high %v236_v5, %v236_v5  ;;  %v240_v9 = vsel %vm219_vm0, %v236_v5, 0.0  ;;  %s337_s29 = scalar_lea.sflag [#allocation4], %s773_s5  ;;  %s555_s15 = scalar_lea.vmem %s797_s21, 128 }
  0x3d   : > { %v222_v10 = vadd.f32 %v221_v6, %v220_v4  ;;  %v228_v11 = vrot.slane %v227_v7, 4  ;;  %v241_v12 = vrot.slane %v240_v9, 4  ;;  %p556_p8 = scmp.ne.s32.totalorder %s797_s21, %s555_s15  ;;  %p856_p9 = scmp.ne.s32.totalorder %s851_s25, 0 }
  0x3e   : > { %v247_v13 = vsel %vm219_vm0, %v238_v8, 0.0  ;;  %s641_s30 = smov [#allocation5]  }
  0x3f   : > { %v223_v14 = vrot.slane %v222_v10, 2  ;;  %v229_v15 = vadd.f32 %v228_v11, %v227_v7  ;;  %v242_v16 = vadd.f32 %v241_v12, %v240_v9  ;;  %v248_v17 = vrot.slane %v247_v13, 4  ;;  %p557_p11 = pnand %p556_p8, %p856_p9  ;;  %s559_s4 = sshll.u32 %s641_s30, 4  ;;  %s560_s4 = int_to_ptr.vmem [resolvable:$false] %s559_s4 }
  0x40   : > { %s561_s7 = scalar_lea.vmem %s560_s4, 256  ;;  %p562_p7 = scmp.lt.s32.totalorder %s797_s21, %s560_s4 }
  0x41   : > { %v224_v18 = vadd.f32 %v223_v14, %v222_v10  ;;  %v230_v19 = vrot.slane %v229_v15, 2  ;;  %v243_v20 = vrot.slane %v242_v16, 2  ;;  %v249_v21 = vadd.f32 %v248_v17, %v247_v13  ;;  %p558_p0 = pneg %p557_p11  ;;  %p563_p13 = scmp.lt.s32.totalorder %s561_s7, %s555_s15 }
  0x43   : > { %v225_v22 = vrot.slane %v224_v18, 1  ;;  %v231_v23 = vadd.f32 %v230_v19, %v229_v15  ;;  %v244_v24 = vadd.f32 %v243_v20, %v242_v16  ;;  %v250_v25 = vrot.slane %v249_v21, 2  ;;  %p564_p3 = por %p563_p13, %p562_p7 }
  0x45   : > { %v226_v26 = vadd.f32 %v225_v22, %v224_v18  ;;  %v232_v27 = vrot.slane %v231_v23, 1  ;;  %v245_v28 = vrot.slane %v244_v24, 1  ;;  %v251_v29 = vadd.f32 %v250_v25, %v249_v21  ;;  %p565_p6 = pnand %p564_p3, %p558_p0 }
  0x47   : > { %v233_v30 = vadd.f32 %v232_v27, %v231_v23  ;;  %v234_v31 = vmul.f32 0.25, %v226_v26  ;;  %v246_v32 = vadd.f32 %v245_v28, %v244_v24  ;;  %v252_v33 = vrot.slane %v251_v29, 1 }
  0x49   : > { %v235_v34 = vmul.f32 0.25, %v233_v30  ;;  %v253_v35 = vadd.f32 %v252_v33, %v251_v29  ;;  %v254_v36 = vmul.f32 0.25, %v246_v32  ;;  %v256_v37 = vmul.f32 %v234_v31, %v234_v31 }
  0x4b   : > { %v255_v38 = vmul.f32 0.25, %v253_v35  ;;  %v257_v39 = vmul.f32 %v235_v34, %v235_v34  ;;  %v258_v40 = vsub.f32 %v254_v36, %v256_v37  ;;  %v262_v44 = vcombine.low %v234_v31, %v235_v34 }
  0x4d   : > { %v259_v41 = vsub.f32 %v255_v38, %v257_v39  ;;  %v265_v42 = vadd.f32 1e-05, %v258_v40  ;;  %v264_v46 = vsub.f32 %v215_v1, %v262_v44 }
  0x4f   : > { %v266_v43 = vadd.f32 1e-05, %v259_v41  ;;  %521 = vrsqrt.f32 %v265_v42 }
  0x51   : > { %523 = vrsqrt.f32 %v266_v43 }
  0x59   : > { %v522_v45 = vpop.eup %521 }
  0x5b   : > { %v524_v47 = vpop.eup %523 }
  0x5c   : > { %v271_v48 = vcombine.low %v522_v45, %v524_v47 }
  0x5e   : > { %v273_v49 = vmul.f32 %v271_v48, %v264_v46 }
  0x60   : > { %v275_v50 = vcombine.high %v273_v49, %v273_v49  ;;  %v277_v51 = vpack.c.bf16 %v273_v49, %v273_v49 }
  0x62   : > { %v278_v52 = vpack.c.bf16 %v275_v50, %v275_v50  ;;  %v285_v53 = vsel %vm283_vm1, %v277_v51, 0 }
  0x64   : > { %447 = vmatprep.subr.msk.bf16.mxu0 %vm283_vm1, %v278_v52 }
  0x65   : > { %291 = vmatpush1.bf16.msra.mxu0 %v285_v53 }
  0x68   : > { %448 = vmatmul.mubr.msk.bf16.vlgmr.msra.gmra.mrb[0].mxu0 %vm279_vm2, %v208_v54 }
  0xba   : > { %v213_v55 = vpop.permute.xlu0 %212 }
 0x13b   : > { %v324_v56 = vpop.f32.mrb[0].mxu0 }
 0x13c   : > { %v325_v57 = vadd.f32 %v324_v56, %v213_v55  ;;  %v326_v58 = vpop.f32.mrb[1].mxu0 }
 0x13d   : > { %v327_v59 = vadd.f32 %v326_v58, %v213_v55  ;;  %v328_v60 = vpop.f32.mrb[2].mxu0 }
 0x13e   : > { %v329_v61 = vpop.f32.mrb[3].mxu0 }
 0x13f   : > { %v333_v62 = vcombine.low %v325_v57, %v327_v59 }
 0x141   : > { %335 = vst [vmem:[%s204_s19] sm:$0xff] %v333_v62 }
 0x142   : > { %568 = shalt.err (!%p565_p6)
}
 0x143   : > { %s569_s5 = scalar_lea.hbm %s795_s28, 128  ;;  %s573_s6 = scalar_lea.hbm %s847_s3, 256 }
 0x144   : > { %p570_p4 = scmp.ne.s32.totalorder %s795_s28, %s569_s5  ;;  %p574_p1 = scmp.lt.u32.totalorder %s795_s28, %s847_s3 }
 0x145   : > { %p575_p2 = scmp.lt.u32.totalorder %s573_s6, %s569_s5  ;;  %p577_p8 = scmp.lt.u32.totalorder %s569_s5, %s795_s28 }
 0x146   : > { %p571_p10 = pnand %p570_p4, %p856_p9 }
 0x147   : > { %p576_p5 = por %p575_p2, %p574_p1 }
 0x148   : > { %p572_p12 = pneg %p571_p10 }
 0x149   : > { %p578_p11 = por %p577_p8, %p576_p5 }
 0x14b   : > { %p579_p0 = pnand %p578_p11, %p572_p12 }
 0x14d   : > { %582 = shalt.err (!%p579_p0)
}
 0x14e   : > { %458 = dma.vmem_to_hbm [thread:$0]  (%p856_p9), %s797_s21, 128, %s795_s28, %s337_s29  }
 0x14f PF: > { %s365_s10 = sand.u32 1, %s617_s12   ;;  %p857_p7 = scmp.ne.s32.totalorder %s852_s27, 0 }
 0x150   : > { %p858_p13 = scmp.ge.s32.totalorder %s637_s17, 2  ;;  %s366_s18 = scalar_lea.sflag [#allocation4], %s365_s10 }
 0x152   : > { %p465_p3 = pnand %p858_p13, %p857_p7 }
 0x154   : > { %612 = dma.done.wait (!%p465_p3), %s366_s18, 128  }
 0x155   : > { %614 = vsyncadd (!%p465_p3), %s366_s18, 4294967168  ;;  %s19_s17 = sadd.s32 1, %s637_s17   ;;  %s859_s12 = smov %s621_s13 }
 0x156   : > { %p16_p6 = scmp.ge.s32.totalorder %s19_s17, 4   ;;  %s860_s13 = smov %s625_s14 }
 0x157   : > { %s861_s14 = smov %s718_s26  ;;  %s862_s15 = smov %s633_s16 }
 0x158   : > { %s863_s16 = smov %s865_s20  ;;  %18 = sbr.rel (!%p16_p6) target bundleno = 6 (0x6), region = 77 }
 0x15f   :  { %371 = vsyncpa [#allocation3], 1 }
 0x160   :  { %373 = vsyncpa [#allocation3 + $0x1], 1 }
 0x161   :  { %374 = vsyncpa [#allocation4], 1 }
 0x162   :  { %376 = vsyncpa [#allocation4 + $0x1], 1 }

</bundles_post_ra>
